<compile_context>
chip_gen: v5e
topology: v5e:2x2
jax: 0.10.0
libtpu: 0.0.40
codegen_flags: <defaults>
</compile_context>

<pallas_src>
import functools
import math

import jax
import jax.numpy as jnp
from jax.experimental import pallas as pl
from jax.experimental.pallas import tpu as pltpu


def layernorm_kernel(x_ref, g_ref, b_ref, o_ref, *, eps, d_model):
    # x block: (row_tile, d_model). Last dim equals the true feature extent, so the axis=-1
    # reductions need no padding correction.
    x = x_ref[...].astype(jnp.float32)
    mean = jnp.sum(x, axis=-1, keepdims=True) * (1.0 / d_model)
    xc = x - mean                                            # reused for the output
    # Two-pass, unbiased (N-1) variance to match torch.var() used by the spec module.
    var = jnp.sum(xc * xc, axis=-1, keepdims=True) * (1.0 / max(d_model - 1, 1))
    inv = jax.lax.rsqrt(var + eps)                           # (row_tile, 1)

    g = g_ref[0:1, :].astype(jnp.float32)                    # (1, d_model), static slice = view
    b = b_ref[0:1, :].astype(jnp.float32)
    # Row-broadcast scale first, then per-feature affine; no (row_tile, d_model) `scale` temp.
    o_ref[...] = ((xc * inv) * g + b).astype(o_ref.dtype)


def _round_up(a, b):
    return (a + b - 1) // b * b


def _pick_row_tile(rows, d_model, x_itemsize, vmem_limit):
    # Target ~8 MiB input blocks (>= ~85% of HBM roofline per measured tile-size curve) so the
    # ~0.35 us per-grid-step overhead stays hidden, even for small d_model.
    target_bytes = 8 << 20
    row_tile = max(16, target_bytes // max(1, d_model * x_itemsize))

    # VMEM budget: in + out blocks double-buffered, plus ~2 live f32 full-tile temporaries
    # (x_f32 and xc). Keep 25% headroom under the scoped limit.
    per_row_bytes = d_model * (2 * x_itemsize + 2 * x_itemsize + 2 * 4)
    max_rows_vmem = max(16, (vmem_limit * 3 // 4) // per_row_bytes)
    row_tile = min(row_tile, max_rows_vmem)

    # v7x megacore: keep >= 2 grid steps so the "parallel" row axis shards across both TCs.
    if rows > 32:
        row_tile = min(row_tile, _round_up(-(-rows // 2), 16))

    # Sublane alignment (multiple of 16 covers both f32 and bf16 packing); never exceed rows.
    row_tile = max(16, row_tile - row_tile % 16)
    row_tile = min(row_tile, _round_up(rows, 16))
    return int(row_tile)


def layer_norm(x, gamma, beta, eps=1e-6, row_tile=None):
    orig_shape = x.shape
    d_model = orig_shape[-1]
    rows = math.prod(orig_shape[:-1]) if len(orig_shape) > 1 else 1

    x2 = x.reshape(rows, d_model)
    # Replicate params across 8 sublanes once (tiny) so their block is an aligned (8, d) layout.
    g2 = jnp.broadcast_to(gamma.reshape(1, d_model), (8, d_model))
    b2 = jnp.broadcast_to(beta.reshape(1, d_model), (8, d_model))

    x_itemsize = jnp.dtype(x.dtype).itemsize

    # VMEM-aware scoped limit (v7x: 64 MiB physical; v5e/v6e: 128 MiB).
    try:
        vmem_cap = int(pltpu.get_tpu_info().vmem_capacity_bytes)
    except Exception:
        vmem_cap = 128 << 20
    if vmem_cap >= (128 << 20):
        vmem_limit = 96 << 20                       # v5e / v6e
    else:
        vmem_limit = max(16 << 20, vmem_cap // 2)   # v7x: ~32 MiB scoped

    if row_tile is None:
        row_tile = _pick_row_tile(rows, d_model, x_itemsize, vmem_limit)
    row_tile = max(16, row_tile - row_tile % 16)
    row_tile = min(row_tile, _round_up(rows, 16))

    grid = (pl.cdiv(rows, row_tile),)               # partial last block: no row padding needed

    # Memory-bound hint for the XLA scheduler.
    cost = pl.CostEstimate(
        flops=8 * rows * d_model,
        transcendentals=rows,                       # one rsqrt per row
        bytes_accessed=2 * rows * d_model * x_itemsize + 2 * 8 * d_model * 4,
    )

    out = pl.pallas_call(
        functools.partial(layernorm_kernel, eps=eps, d_model=d_model),
        out_shape=jax.ShapeDtypeStruct((rows, d_model), x.dtype),
        grid_spec=pltpu.PrefetchScalarGridSpec(
            num_scalar_prefetch=0,
            grid=grid,
            in_specs=[
                pl.BlockSpec((row_tile, d_model), lambda i: (i, 0)),
                pl.BlockSpec((8, d_model), lambda i: (0, 0)),
                pl.BlockSpec((8, d_model), lambda i: (0, 0)),
            ],
            out_specs=pl.BlockSpec((row_tile, d_model), lambda i: (i, 0)),
        ),
        compiler_params=pltpu.CompilerParams(
            dimension_semantics=("parallel",),      # row axis shards across v7x's 2 TCs
            vmem_limit_bytes=vmem_limit,
        ),
        cost_estimate=cost,
    )(x2, g2, b2)

    return out.reshape(orig_shape)


if __name__ == "__main__":
    key = jax.random.PRNGKey(0)
    batch, seq, d_model = 2, 8, 32

    x = jax.random.normal(key, (batch, seq, d_model), dtype=jnp.float32)
    # Deterministic parameter init (matches nn.Parameter(torch.ones/zeros(d_model)))
    gamma = jnp.ones((d_model,), dtype=jnp.float32)
    beta = jnp.zeros((d_model,), dtype=jnp.float32)

    out = layer_norm(x, gamma, beta, eps=1e-6)
    out = jax.block_until_ready(out)

    # Reference in plain JAX: same semantics as the PyTorch module
    # (unbiased variance = torch.var default, eps=1e-6).
    mean = x.mean(-1, keepdims=True)
    var = jnp.sum((x - mean) ** 2, axis=-1, keepdims=True) / (d_model - 1)
    ref = (x - mean) / jnp.sqrt(var + 1e-6) * gamma + beta
    assert jnp.allclose(out, ref, atol=1e-5, rtol=1e-5), "mismatch vs reference"

    print("KERNEL_OK")
</pallas_src>

<mosaic_0001>
module attributes {stable_mosaic.version = 11 : i64} {
  func.func @layernorm_kernel(%arg0: i32, %arg1: memref<16x32xf32, #tpu.memory_space<vmem>>, %arg2: memref<8x32xf32, #tpu.memory_space<vmem>>, %arg3: memref<8x32xf32, #tpu.memory_space<vmem>>, %arg4: memref<16x32xf32, #tpu.memory_space<vmem>>) attributes {dimension_semantics = [#tpu.dimension_semantics<parallel>], iteration_bounds = array<i64: 1>, scalar_prefetch = 0 : i64, scratch_operands = 0 : i64, tpu.core_type = #tpu.core_type<tc>, window_params = [{transform_indices = @transform_0, window_bounds = array<i64: 16, 32>}, {pipeline_mode = #tpu.pipeline_mode<synchronous>, transform_indices = @transform_1, window_bounds = array<i64: 8, 32>}, {pipeline_mode = #tpu.pipeline_mode<synchronous>, transform_indices = @transform_2, window_bounds = array<i64: 8, 32>}, {transform_indices = @transform_3, window_bounds = array<i64: 16, 32>}]} {
    %c0 = arith.constant 0 : index
    %c0_0 = arith.constant 0 : index
    %0 = vector.load %arg1[%c0, %c0_0] : memref<16x32xf32, #tpu.memory_space<vmem>>, vector<16x32xf32>
    %cst = arith.constant dense<0.000000e+00> : vector<16xf32>
    %1 = vector.multi_reduction <add>, %0, %cst [1] : vector<16x32xf32> to vector<16xf32>
    %2 = vector.shape_cast %1 : vector<16xf32> to vector<16x1xf32>
    %cst_1 = arith.constant 3.125000e-02 : f32
    %3 = vector.broadcast %cst_1 : f32 to vector<16x1xf32>
    %4 = arith.mulf %2, %3 : vector<16x1xf32>
    %5 = vector.broadcast %4 : vector<16x1xf32> to vector<16x32xf32>
    %6 = arith.subf %0, %5 : vector<16x32xf32>
    %7 = arith.mulf %6, %6 : vector<16x32xf32>
    %cst_2 = arith.constant dense<0.000000e+00> : vector<16xf32>
    %8 = vector.multi_reduction <add>, %7, %cst_2 [1] : vector<16x32xf32> to vector<16xf32>
    %9 = vector.shape_cast %8 : vector<16xf32> to vector<16x1xf32>
    %cst_3 = arith.constant 0.0322580636 : f32
    %10 = vector.broadcast %cst_3 : f32 to vector<16x1xf32>
    %11 = arith.mulf %9, %10 : vector<16x1xf32>
    %cst_4 = arith.constant 9.99999997E-7 : f32
    %12 = vector.broadcast %cst_4 : f32 to vector<16x1xf32>
    %13 = arith.addf %11, %12 : vector<16x1xf32>
    %14 = math.rsqrt %13 : vector<16x1xf32>
    %c0_5 = arith.constant 0 : index
    %c0_6 = arith.constant 0 : index
    %15 = vector.load %arg2[%c0_5, %c0_6] : memref<8x32xf32, #tpu.memory_space<vmem>>, vector<1x32xf32>
    %c0_7 = arith.constant 0 : index
    %c0_8 = arith.constant 0 : index
    %16 = vector.load %arg3[%c0_7, %c0_8] : memref<8x32xf32, #tpu.memory_space<vmem>>, vector<1x32xf32>
    %17 = vector.broadcast %14 : vector<16x1xf32> to vector<16x32xf32>
    %18 = arith.mulf %6, %17 : vector<16x32xf32>
    %19 = vector.broadcast %15 : vector<1x32xf32> to vector<16x32xf32>
    %20 = arith.mulf %18, %19 : vector<16x32xf32>
    %21 = vector.broadcast %16 : vector<1x32xf32> to vector<16x32xf32>
    %22 = arith.addf %20, %21 : vector<16x32xf32>
    %c0_9 = arith.constant 0 : index
    %c0_10 = arith.constant 0 : index
    %23 = vector.load %arg4[%c0_9, %c0_10] : memref<16x32xf32, #tpu.memory_space<vmem>>, vector<16x32xf32>
    tpu.vector_store %arg4[%c0_9, %c0_10], %22 {strides = array<i32>} : memref<16x32xf32, #tpu.memory_space<vmem>>, vector<16x32xf32>,
    return
  }
  func.func @transform_0(%arg0: i32) -> (i32, i32) {
    %c0_i32 = arith.constant 0 : i32
    %c0_i32_0 = arith.constant 0 : i32
    return %arg0, %c0_i32 : i32, i32
  }
  func.func @transform_1(%arg0: i32) -> (i32, i32) {
    %c0_i32 = arith.constant 0 : i32
    %c0_i32_0 = arith.constant 0 : i32
    %c0_i32_1 = arith.constant 0 : i32
    return %c0_i32, %c0_i32_0 : i32, i32
  }
  func.func @transform_2(%arg0: i32) -> (i32, i32) {
    %c0_i32 = arith.constant 0 : i32
    %c0_i32_0 = arith.constant 0 : i32
    %c0_i32_1 = arith.constant 0 : i32
    return %c0_i32, %c0_i32_0 : i32, i32
  }
  func.func @transform_3(%arg0: i32) -> (i32, i32) {
    %c0_i32 = arith.constant 0 : i32
    %c0_i32_0 = arith.constant 0 : i32
    return %arg0, %c0_i32 : i32, i32
  }
}

</mosaic_0001>

<bundles_post_ra>
// kernel: tpu_custom_call.1
= control target key start
LH: loop header
LB: loop body
LE: loop exit
PB: predicated region body
PF: predicated region fallthrough
CT: control target
= control target key end

     0   :  { %8 = vsyncpa [#allocation3], 0  ;;  %s299_s0 = inlined_call_operand.hbm [shape: f32[16,32], index: 0, kind: input, shape index: {}]   ;;  %s300_s1 = inlined_call_operand.hbm [shape: f32[8,32], index: 1, kind: input, shape index: {}]   ;;  %s301_s2 = inlined_call_operand.hbm [shape: f32[8,32], index: 2, kind: input, shape index: {}]   ;;  %s302_s3 = inlined_call_operand.hbm [shape: f32[16,32], index: 3, kind: output, shape index: {}]  }
   0x1   :  { %9 = vsyncpa [#allocation6], 0  ;;  %s29_s14 = sshll.u32 %s300_s1, 4  ;;  %s30_s14 = int_to_ptr.hbm [resolvable:$true] %s29_s14 }
   0x2   :  { %10 = vsyncpa [#allocation4], 0  ;;  %s249_s15 = smov [#allocation5]   ;;  %s15_s19 = sshll.u32 %s299_s0, 4  ;;  %s16_s19 = int_to_ptr.hbm [resolvable:$true] %s15_s19 }
   0x3   :  { %s31_s16 = sshll.u32 %s249_s15, 4  ;;  %s250_s20 = smov [#allocation2]   ;;  %s32_s16 = int_to_ptr.vmem [resolvable:$true] %s31_s16 }
   0x4   :  { %34 = dma.hbm_to_vmem [thread:$0]  %s30_s14, 128, %s32_s16, [#allocation6]  }
   0x5   :  { %s17_s21 = sshll.u32 %s250_s20, 4  ;;  %s251_s22 = smov 128   ;;  %s18_s21 = int_to_ptr.vmem [resolvable:$true] %s17_s21 }
   0x6   :  { %s252_s23 = smov 8   ;;  %s40_s25 = sshll.u32 %s301_s2, 4  ;;  %s41_s25 = int_to_ptr.hbm [resolvable:$true] %s40_s25 }
   0x7   :  { %23 = dma.hbm_to_vmem [thread:$0]  %s16_s19, 256, %s18_s21, [#allocation3], %s251_s22, %s251_s22, %s252_s23  }
   0x8   :  { %s253_s26 = smov [#allocation7]  }
   0x9   :  { %s42_s27 = sshll.u32 %s253_s26, 4  ;;  %s43_s27 = int_to_ptr.vmem [resolvable:$true] %s42_s27 }
   0xa   :  { %45 = dma.hbm_to_vmem [thread:$0]  %s41_s25, 128, %s43_s27, [#allocation6]  }
   0xb   :  { %243 = dma.done.wait [#allocation3], 256  }
   0xc   :  { %244 = vsyncadd [#allocation3], 4294967040 }
   0xd   :  { %245 = dma.done.wait [#allocation6], 256  }
   0xe   :  { %246 = vsyncadd [#allocation6], 4294967040  ;;  %vm60_vm0 = vcmask 261120   ;;  %v58_v0 = vld [vmem:[#allocation2] sm:$0xff]  ;;  %v59_v2 = vld [vmem:[#allocation2 + $0x8] sm:$0xff]  ;;  %s254_s0 = smov [#allocation8]  }
   0xf   :  { %v61_v1 = vsel %vm60_vm0, %v58_v0, 0.0  ;;  %v64_v3 = vsel %vm60_vm0, %v59_v2, 0.0  ;;  %v141_v28 = vld [vmem:[#allocation5] ss:$0 sm:$0xff]  ;;  %v142_v32 = vld [vmem:[#allocation7] ss:$0 sm:$0xff] }
  0x10   :  { %62 = vadd.xlane.f32.xlu0 %v61_v1  ;;  %s119_s2 = sshll.u32 %s254_s0, 4  ;;  %s121_s30 = sshll.u32 %s302_s3, 4  ;;  %s120_s2 = int_to_ptr.vmem [resolvable:$true] %s119_s2  ;;  %s122_s30 = int_to_ptr.hbm [resolvable:$true] %s121_s30 }
  0x18   :  { %65 = vadd.xlane.f32.xlu0 %v64_v3 }
  0x83   :  { %v63_v4 = vpop.xlane.xlu0 %62 }
  0x84   :  { %v67_v5 = vmul.f32 0.03125, %v63_v4 }
  0x86   :  { %v69_v6 = vsub.f32 %v58_v0, %v67_v5 }
  0x88   :  { %v71_v7 = vmul.f32 %v69_v6, %v69_v6 }
  0x8a   :  { %v73_v8 = vsel %vm60_vm0, %v71_v7, 0.0 }
  0x8b   :  { %74 = vadd.xlane.f32.xlu1 %v73_v8  ;;  %v66_v9 = vpop.xlane.xlu0 %65 }
  0x8c   :  { %v68_v10 = vmul.f32 0.03125, %v66_v9 }
  0x8e   :  { %v70_v11 = vsub.f32 %v59_v2, %v68_v10 }
  0x90   :  { %v72_v12 = vmul.f32 %v70_v11, %v70_v11 }
  0x92   :  { %v76_v13 = vsel %vm60_vm0, %v72_v12, 0.0 }
  0x93   :  { %77 = vadd.xlane.f32.xlu1 %v76_v13 }
  0xfe   :  { %v75_v14 = vpop.xlane.xlu1 %74 }
  0xff   :  { %v79_v15 = vmul.f32 0.032258064, %v75_v14 }
 0x101   :  { %v81_v16 = vadd.f32 1e-06, %v79_v15 }
 0x103   :  { %143 = vrsqrt.f32 %v81_v16  ;;  %vm89_vm2 = vweird.f32 %v81_v16 }
 0x106   :  { %v78_v17 = vpop.xlane.xlu1 %77 }
 0x107   :  { %v80_v18 = vmul.f32 0.032258064, %v78_v17 }
 0x109   :  { %v144_v19 = vpop.eup %143  ;;  %v82_v20 = vadd.f32 1e-06, %v80_v18 }
 0x10a   :  { %v84_v21 = vmul.f32 %v144_v19, %v81_v16  ;;  %vm90_vm1 = vweird.f32 %v144_v19 }
 0x10b   :  { %145 = vrsqrt.f32 %v82_v20  ;;  %vm91_vm3 = vmor %vm89_vm2, %vm90_vm1  ;;  %vm99_vm5 = vweird.f32 %v82_v20 }
 0x10c   :  { %v85_v22 = vmul.f32 %v144_v19, %v84_v21 }
 0x10e   :  { %v86_v23 = vmul.f32 0.5, %v85_v22 }
 0x110   :  { %v87_v24 = vsub.f32 1.5, %v86_v23 }
 0x111   :  { %v146_v25 = vpop.eup %145 }
 0x112   :  { %v88_v26 = vmul.f32 %v144_v19, %v87_v24  ;;  %v94_v27 = vmul.f32 %v146_v25, %v82_v20  ;;  %vm100_vm4 = vweird.f32 %v146_v25 }
 0x113   :  { %vm101_vm6 = vmor %vm99_vm5, %vm100_vm4 }
 0x114   :  { %v92_v29 = vsel %vm91_vm3, %v144_v19, %v88_v26  ;;  %v95_v30 = vmul.f32 %v146_v25, %v94_v27 }
 0x115   :  { %v105_v31 = vmul.f32 %v92_v29, %v69_v6 }
 0x116   :  { %v96_v33 = vmul.f32 0.5, %v95_v30 }
 0x117   :  { %v108_v34 = vmul.f32 %v141_v28, %v105_v31 }
 0x118   :  { %v97_v35 = vsub.f32 1.5, %v96_v33 }
 0x119   :  { %v111_v36 = vadd.f32 %v142_v32, %v108_v34 }
 0x11a   :  { %v98_v37 = vmul.f32 %v146_v25, %v97_v35 }
 0x11b   :  { %113 = vst.msk [vmem:[#allocation8] sm:$0xff] %vm60_vm0, %v111_v36 }
 0x11c   :  { %v102_v38 = vsel %vm101_vm6, %v146_v25, %v98_v37 }
 0x11d   :  { %v106_v39 = vmul.f32 %v102_v38, %v70_v11 }
 0x11f   :  { %v109_v40 = vmul.f32 %v141_v28, %v106_v39 }
 0x121   :  { %v112_v41 = vadd.f32 %v142_v32, %v109_v40 }
 0x123   :  { %114 = vst.msk [vmem:[#allocation8 + $0x8] sm:$0xff] %vm60_vm0, %v112_v41 }
 0x124   :  { %127 = dma.vmem_to_hbm [thread:$0]  %s120_s2, 256, %s122_s30, [#allocation4], %s251_s22, %s251_s22, %s252_s23  }
 0x125   :  { %247 = dma.done.wait [#allocation4], 256  }
 0x126   :  { %248 = vsyncadd [#allocation4], 4294967040 }
 0x127   :  { %132 = vsyncpa [#allocation3], 1 }
 0x128   :  { %133 = vsyncpa [#allocation6], 1 }
 0x129   :  { %134 = vsyncpa [#allocation4], 1 }

</bundles_post_ra>
